<compile_context>
chip_gen: v6e
topology: v6e:2x2x1
jax: 0.10.0
libtpu: 0.0.40
codegen_flags: <defaults>
</compile_context>

<pallas_src>
import functools
import re

import jax
import jax.numpy as jnp
from jax.experimental import pallas as pl
from jax.experimental.pallas import tpu as pltpu


def _round_up(x, m):
    return ((x + m - 1) // m) * m


def _tpu_generation():
    """Best-effort TPU generation from the device kind string (default: 6)."""
    try:
        kind = jax.devices()[0].device_kind
    except Exception:
        return 6
    m = re.search(r"(\d+)", kind)
    return int(m.group(1)) if m else 6


def _gen_params(gen):
    """Returns (vpu_harmonic_thresh, vmem_budget_bytes, vmem_limit_bytes,
    min_grid_steps) tuned per TPU generation."""
    if gen >= 7:
        # v7x: 64 MiB VMEM (32 MiB scoped default), ~3.2 TB/s HBM, 2 TCs per
        # chip -> smaller VMEM budget, earlier MXU crossover, >=8 grid steps.
        return 5.0, 16 * 2**20, 28 * 2**20, 8
    if gen == 6:
        return 10.0, 32 * 2**20, 64 * 2**20, 4
    # v5e and older: weaker VPU -> the unrolled channel loop stays profitable
    # slightly longer; 128 MiB physical VMEM.
    return 16.0, 32 * 2**20, 64 * 2**20, 4


def _choose_tiling(n, c_in, c_out, hw, *, vmem_budget_bytes,
                   target_step_in_bytes, max_nb, min_grid_steps):
    """Pick (nb, ts): batch block and lane-dense spatial tile."""
    c_in_p = _round_up(max(c_in, 1), 8)     # f32 sublane padding
    c_out_p = _round_up(max(c_out, 1), 8)
    # Per-lane, per-image VMEM cost: double-buffered x + o tiles (2x) plus ~1x
    # for in-kernel intermediates (h / acc), all sublane-padded.
    bytes_per_lane_img = 3 * (c_in_p + c_out_p) * 4

    # Largest 128-aligned spatial tile that fits the budget with nb = 1.
    max_ts = max(128, (vmem_budget_bytes // bytes_per_lane_img) // 128 * 128)

    if hw % 128 != 0 and hw <= max_ts:
        # Non-128-aligned spatial extent that fits: a single full-extent block
        # is always legal (block dim == full array dim).
        # TODO(synk): if a non-aligned extent ever exceeds the budget, pad H*W
        # once in the wrapper instead.
        ts = hw
    else:
        ts = min(_round_up(hw, 128), max_ts)   # 128-aligned; ragged last tile

    # Batch blocking: aim for >= target bytes of input per grid step.
    per_img_bytes = c_in * ts * 4
    nb = int(max(1, min(n, max_nb,
                        target_step_in_bytes // max(per_img_bytes, 1),
                        vmem_budget_bytes // max(bytes_per_lane_img * ts, 1))))
    # Keep nb an exact divisor of n so the leading (batch) block dim never
    # goes out of bounds.
    while n % nb != 0:
        nb -= 1

    # Keep the pipeline non-degenerate and both v7x TensorCores busy: ensure a
    # few grid steps, shrinking ts first (stays 128-aligned), then nb.
    def n_steps(nb_, ts_):
        return (n // nb_) * (-(-hw // ts_))

    while n_steps(nb, ts) < min_grid_steps and ts > 128 and ts % 128 == 0:
        ts = max(128, _round_up(ts // 2, 128))
    while n_steps(nb, ts) < min_grid_steps and nb > 1:
        nb = max(1, nb // 2)
        while n % nb != 0:
            nb -= 1
    return nb, ts


def _decoder_kernel(x_ref, scale_ref, shift_ref, w_ref, b_ref, o_ref, *,
                    use_mxu):
    # x_ref:     (nb, C_in, ts)   NCHW-native spatial tile of nb images
    # scale_ref: (C_in, 1)        folded BN scale = gamma / sqrt(var + eps)
    # shift_ref: (C_in, 1)        folded BN shift = beta - mean * scale
    # w_ref:     (C_out, C_in)    1x1 conv weight
    # b_ref:     (C_out, 1)       conv bias
    # o_ref:     (nb, C_out, ts)  lane-dense output tile
    nb = x_ref.shape[0]
    c_in = x_ref.shape[1]
    scale = scale_ref[...]
    shift = shift_ref[...]
    w = w_ref[...]
    b = b_ref[...]

    if use_mxu:
        # Channel counts large enough that the MXU is worth it (its push lives
        # in the vex slot, free in this mem-bound kernel).  nb is capped small
        # on this path, so the Python unroll stays short.
        for bi in range(nb):
            h = jnp.maximum(x_ref[bi] * scale + shift, 0.0)          # (C_in, ts)
            o_ref[bi] = jnp.dot(w, h,
                                preferred_element_type=jnp.float32) + b
    else:
        # Tiny channel counts: unrolled VPU multiply-adds, vectorized over the
        # batch block.  Bias is folded into the first term (no epilogue pass).
        x = x_ref[...]                                               # (nb, C_in, ts)
        h = jnp.maximum(x * scale[None] + shift[None], 0.0)
        acc = w[None, :, 0:1] * h[:, 0:1, :] + b[None]               # (nb, C_out, ts)
        for c in range(1, c_in):
            acc = acc + w[None, :, c:c + 1] * h[:, c:c + 1, :]
        o_ref[...] = acc


@functools.partial(jax.jit, static_argnames=("eps",))
def decoder_forward(x_nchw, gamma, beta, running_mean, running_var,
                    conv_w, conv_b, *, eps=1e-5):
    """x_nchw: (N, C_in, H, W) float32. conv_w: (C_out, C_in, 1, 1)."""
    n, c_in, h, w = x_nchw.shape
    c_out = conv_w.shape[0]
    hw = h * w

    gen = _tpu_generation()
    vpu_thresh, vmem_budget, vmem_limit, min_steps = _gen_params(gen)

    # MXU/VPU crossover on the harmonic mean of the channel counts; also bound
    # the size of the unrolled VPU channel loop.
    harmonic = (c_in * c_out) / float(c_in + c_out)
    use_mxu = (harmonic > vpu_thresh) or (c_in > 64)

    nb, ts = _choose_tiling(
        n, c_in, c_out, hw,
        vmem_budget_bytes=vmem_budget,
        target_step_in_bytes=2 * 2**20,
        max_nb=8 if use_mxu else 32,
        min_grid_steps=min_steps)

    # Fold BN (eval mode) into per-channel scale/shift, stored as (C, 1)
    # columns so they broadcast across the lane (spatial) axis in the kernel.
    scale = gamma * jax.lax.rsqrt(running_var + eps)
    shift = beta - running_mean * scale

    x = x_nchw.reshape(n, c_in, hw)            # free reshape of contiguous NCHW
    scale2 = scale.reshape(c_in, 1).astype(jnp.float32)
    shift2 = shift.reshape(c_in, 1).astype(jnp.float32)
    w2 = conv_w.reshape(c_out, c_in).astype(jnp.float32)
    b2 = conv_b.reshape(c_out, 1).astype(jnp.float32)

    grid = (n // nb, pl.cdiv(hw, ts))          # both axes independent

    kernel = functools.partial(_decoder_kernel, use_mxu=use_mxu)

    out = pl.pallas_call(
        kernel,
        out_shape=jax.ShapeDtypeStruct((n, c_out, hw), jnp.float32),
        grid_spec=pltpu.PrefetchScalarGridSpec(
            num_scalar_prefetch=0,
            grid=grid,
            in_specs=[
                # TODO(synk): if profiling shows exposed DMA for tiny C_in
                # (short strided segments), add pipeline_mode=pl.Buffered(3).
                pl.BlockSpec((nb, c_in, ts), lambda i, s: (i, 0, s)),
                pl.BlockSpec((c_in, 1), lambda i, s: (0, 0)),
                pl.BlockSpec((c_in, 1), lambda i, s: (0, 0)),
                pl.BlockSpec((c_out, c_in), lambda i, s: (0, 0)),
                pl.BlockSpec((c_out, 1), lambda i, s: (0, 0)),
            ],
            out_specs=pl.BlockSpec((nb, c_out, ts), lambda i, s: (i, 0, s)),
        ),
        compiler_params=pltpu.CompilerParams(
            dimension_semantics=("parallel", "parallel"),
            vmem_limit_bytes=int(vmem_limit)),
    )(x, scale2, shift2, w2, b2)

    return out.reshape(n, c_out, h, w)         # free reshape back to NCHW


def _reference(x_nchw, gamma, beta, running_mean, running_var,
               conv_w, conv_b, eps=1e-5):
    scale = gamma * jax.lax.rsqrt(running_var + eps)
    shift = beta - running_mean * scale
    hid = jnp.maximum(
        x_nchw * scale[None, :, None, None] + shift[None, :, None, None], 0.0)
    out = jnp.einsum("nchw,oc->nohw", hid, conv_w.reshape(conv_w.shape[0], -1))
    return out + conv_b[None, :, None, None]


def _run_case(case_idx, n, c_in, h, w, c_out, atol, rtol):
    key = jax.random.fold_in(jax.random.PRNGKey(0), case_idx)
    kx, kg, kb, km, kv, kw, kc = jax.random.split(key, 7)

    x = jax.random.normal(kx, (n, c_in, h, w), dtype=jnp.float32)
    gamma = 1.0 + 0.1 * jax.random.normal(kg, (c_in,), dtype=jnp.float32)
    beta = 0.1 * jax.random.normal(kb, (c_in,), dtype=jnp.float32)
    running_mean = 0.1 * jax.random.normal(km, (c_in,), dtype=jnp.float32)
    running_var = 1.0 + 0.1 * jax.random.uniform(kv, (c_in,), dtype=jnp.float32)
    conv_w = 0.5 * jax.random.normal(kw, (c_out, c_in, 1, 1), dtype=jnp.float32)
    conv_b = 0.1 * jax.random.normal(kc, (c_out,), dtype=jnp.float32)

    out = decoder_forward(x, gamma, beta, running_mean, running_var,
                          conv_w, conv_b)
    out = jax.block_until_ready(out)
    ref = _reference(x, gamma, beta, running_mean, running_var, conv_w, conv_b)

    assert out.shape == (n, c_out, h, w), out.shape
    err = float(jnp.max(jnp.abs(out - ref)))
    assert jnp.allclose(out, ref, atol=atol, rtol=rtol), \
        (n, c_in, h, w, c_out, err)
    return err


if __name__ == "__main__":
    # Primary small config consistent with the module: N=2, C_in=4, 16x16 -> 8.
    _run_case(0, 2, 4, 16, 16, 8, atol=1e-5, rtol=1e-5)   # VPU path
    # Batch-blocked VPU path (nb > 1).
    _run_case(1, 4, 4, 32, 32, 8, atol=1e-5, rtol=1e-5)
    # MXU path (channel counts past the harmonic-mean crossover).  Looser
    # tolerance: f32 MXU matmuls may use bf16 pass decomposition on TPU.
    _run_case(2, 2, 64, 16, 16, 64, atol=2e-2, rtol=2e-2)
    # Non-128-aligned spatial extent (single full-extent spatial block).
    _run_case(3, 2, 4, 20, 20, 8, atol=1e-5, rtol=1e-5)
    print("KERNEL_OK")
</pallas_src>

<mosaic_0001>
module attributes {stable_mosaic.version = 11 : i64} {
  func.func @_decoder_kernel(%arg0: i32, %arg1: i32, %arg2: memref<1x4x128xf32, #tpu.memory_space<vmem>>, %arg3: memref<4x1xf32, #tpu.memory_space<vmem>>, %arg4: memref<4x1xf32, #tpu.memory_space<vmem>>, %arg5: memref<8x4xf32, #tpu.memory_space<vmem>>, %arg6: memref<8x1xf32, #tpu.memory_space<vmem>>, %arg7: memref<1x8x128xf32, #tpu.memory_space<vmem>>) attributes {dimension_semantics = [#tpu.dimension_semantics<parallel>, #tpu.dimension_semantics<parallel>], iteration_bounds = array<i64: 2, 2>, scalar_prefetch = 0 : i64, scratch_operands = 0 : i64, tpu.core_type = #tpu.core_type<tc>, window_params = [{transform_indices = @transform_0, window_bounds = array<i64: 1, 4, 128>}, {pipeline_mode = #tpu.pipeline_mode<synchronous>, transform_indices = @transform_1, window_bounds = array<i64: 4, 1>}, {pipeline_mode = #tpu.pipeline_mode<synchronous>, transform_indices = @transform_2, window_bounds = array<i64: 4, 1>}, {pipeline_mode = #tpu.pipeline_mode<synchronous>, transform_indices = @transform_3, window_bounds = array<i64: 8, 4>}, {pipeline_mode = #tpu.pipeline_mode<synchronous>, transform_indices = @transform_4, window_bounds = array<i64: 8, 1>}, {transform_indices = @transform_5, window_bounds = array<i64: 1, 8, 128>}]} {
    %c0 = arith.constant 0 : index
    %c0_0 = arith.constant 0 : index
    %0 = vector.load %arg3[%c0, %c0_0] : memref<4x1xf32, #tpu.memory_space<vmem>>, vector<4x1xf32>
    %c0_1 = arith.constant 0 : index
    %c0_2 = arith.constant 0 : index
    %1 = vector.load %arg4[%c0_1, %c0_2] : memref<4x1xf32, #tpu.memory_space<vmem>>, vector<4x1xf32>
    %c0_3 = arith.constant 0 : index
    %c0_4 = arith.constant 0 : index
    %2 = vector.load %arg5[%c0_3, %c0_4] : memref<8x4xf32, #tpu.memory_space<vmem>>, vector<8x4xf32>
    %c0_5 = arith.constant 0 : index
    %c0_6 = arith.constant 0 : index
    %3 = vector.load %arg6[%c0_5, %c0_6] : memref<8x1xf32, #tpu.memory_space<vmem>>, vector<8x1xf32>
    %c0_7 = arith.constant 0 : index
    %c0_8 = arith.constant 0 : index
    %c0_9 = arith.constant 0 : index
    %4 = vector.load %arg2[%c0_7, %c0_8, %c0_9] : memref<1x4x128xf32, #tpu.memory_space<vmem>>, vector<1x4x128xf32>
    %5 = vector.shape_cast %0 : vector<4x1xf32> to vector<1x4x1xf32>
    %6 = vector.broadcast %5 : vector<1x4x1xf32> to vector<1x4x128xf32>
    %7 = arith.mulf %4, %6 : vector<1x4x128xf32>
    %8 = vector.shape_cast %1 : vector<4x1xf32> to vector<1x4x1xf32>
    %9 = vector.broadcast %8 : vector<1x4x1xf32> to vector<1x4x128xf32>
    %10 = arith.addf %7, %9 : vector<1x4x128xf32>
    %cst = arith.constant 0.000000e+00 : f32
    %11 = vector.broadcast %cst : f32 to vector<1x4x128xf32>
    %12 = arith.maximumf %10, %11 : vector<1x4x128xf32>
    %13 = vector.extract_strided_slice %2 {offsets = [0, 0], sizes = [8, 1], strides = [1, 1]} : vector<8x4xf32> to vector<8x1xf32>
    %14 = vector.shape_cast %13 : vector<8x1xf32> to vector<1x8x1xf32>
    %15 = vector.extract_strided_slice %12 {offsets = [0, 0, 0], sizes = [1, 1, 128], strides = [1, 1, 1]} : vector<1x4x128xf32> to vector<1x1x128xf32>
    %16 = vector.broadcast %14 : vector<1x8x1xf32> to vector<1x8x128xf32>
    %17 = vector.broadcast %15 : vector<1x1x128xf32> to vector<1x8x128xf32>
    %18 = arith.mulf %16, %17 : vector<1x8x128xf32>
    %19 = vector.shape_cast %3 : vector<8x1xf32> to vector<1x8x1xf32>
    %20 = vector.broadcast %19 : vector<1x8x1xf32> to vector<1x8x128xf32>
    %21 = arith.addf %18, %20 : vector<1x8x128xf32>
    %22 = vector.extract_strided_slice %2 {offsets = [0, 1], sizes = [8, 1], strides = [1, 1]} : vector<8x4xf32> to vector<8x1xf32>
    %23 = vector.shape_cast %22 : vector<8x1xf32> to vector<1x8x1xf32>
    %24 = vector.extract_strided_slice %12 {offsets = [0, 1, 0], sizes = [1, 1, 128], strides = [1, 1, 1]} : vector<1x4x128xf32> to vector<1x1x128xf32>
    %25 = vector.broadcast %23 : vector<1x8x1xf32> to vector<1x8x128xf32>
    %26 = vector.broadcast %24 : vector<1x1x128xf32> to vector<1x8x128xf32>
    %27 = arith.mulf %25, %26 : vector<1x8x128xf32>
    %28 = arith.addf %21, %27 : vector<1x8x128xf32>
    %29 = vector.extract_strided_slice %2 {offsets = [0, 2], sizes = [8, 1], strides = [1, 1]} : vector<8x4xf32> to vector<8x1xf32>
    %30 = vector.shape_cast %29 : vector<8x1xf32> to vector<1x8x1xf32>
    %31 = vector.extract_strided_slice %12 {offsets = [0, 2, 0], sizes = [1, 1, 128], strides = [1, 1, 1]} : vector<1x4x128xf32> to vector<1x1x128xf32>
    %32 = vector.broadcast %30 : vector<1x8x1xf32> to vector<1x8x128xf32>
    %33 = vector.broadcast %31 : vector<1x1x128xf32> to vector<1x8x128xf32>
    %34 = arith.mulf %32, %33 : vector<1x8x128xf32>
    %35 = arith.addf %28, %34 : vector<1x8x128xf32>
    %36 = vector.extract_strided_slice %2 {offsets = [0, 3], sizes = [8, 1], strides = [1, 1]} : vector<8x4xf32> to vector<8x1xf32>
    %37 = vector.shape_cast %36 : vector<8x1xf32> to vector<1x8x1xf32>
    %38 = vector.extract_strided_slice %12 {offsets = [0, 3, 0], sizes = [1, 1, 128], strides = [1, 1, 1]} : vector<1x4x128xf32> to vector<1x1x128xf32>
    %39 = vector.broadcast %37 : vector<1x8x1xf32> to vector<1x8x128xf32>
    %40 = vector.broadcast %38 : vector<1x1x128xf32> to vector<1x8x128xf32>
    %41 = arith.mulf %39, %40 : vector<1x8x128xf32>
    %42 = arith.addf %35, %41 : vector<1x8x128xf32>
    %c0_10 = arith.constant 0 : index
    %c0_11 = arith.constant 0 : index
    %c0_12 = arith.constant 0 : index
    %43 = vector.load %arg7[%c0_10, %c0_11, %c0_12] : memref<1x8x128xf32, #tpu.memory_space<vmem>>, vector<1x8x128xf32>
    tpu.vector_store %arg7[%c0_10, %c0_11, %c0_12], %42 {strides = array<i32>} : memref<1x8x128xf32, #tpu.memory_space<vmem>>, vector<1x8x128xf32>,
    return
  }
  func.func @transform_0(%arg0: i32, %arg1: i32) -> (i32, i32, i32) {
    %c0_i32 = arith.constant 0 : i32
    %c0_i32_0 = arith.constant 0 : i32
    return %arg0, %c0_i32, %arg1 : i32, i32, i32
  }
  func.func @transform_1(%arg0: i32, %arg1: i32) -> (i32, i32) {
    %c0_i32 = arith.constant 0 : i32
    %c0_i32_0 = arith.constant 0 : i32
    %c0_i32_1 = arith.constant 0 : i32
    return %c0_i32, %c0_i32_0 : i32, i32
  }
  func.func @transform_2(%arg0: i32, %arg1: i32) -> (i32, i32) {
    %c0_i32 = arith.constant 0 : i32
    %c0_i32_0 = arith.constant 0 : i32
    %c0_i32_1 = arith.constant 0 : i32
    return %c0_i32, %c0_i32_0 : i32, i32
  }
  func.func @transform_3(%arg0: i32, %arg1: i32) -> (i32, i32) {
    %c0_i32 = arith.constant 0 : i32
    %c0_i32_0 = arith.constant 0 : i32
    %c0_i32_1 = arith.constant 0 : i32
    return %c0_i32, %c0_i32_0 : i32, i32
  }
  func.func @transform_4(%arg0: i32, %arg1: i32) -> (i32, i32) {
    %c0_i32 = arith.constant 0 : i32
    %c0_i32_0 = arith.constant 0 : i32
    %c0_i32_1 = arith.constant 0 : i32
    return %c0_i32, %c0_i32_0 : i32, i32
  }
  func.func @transform_5(%arg0: i32, %arg1: i32) -> (i32, i32, i32) {
    %c0_i32 = arith.constant 0 : i32
    %c0_i32_0 = arith.constant 0 : i32
    return %arg0, %c0_i32, %arg1 : i32, i32, i32
  }
}

</mosaic_0001>

<bundles_post_ra>
// kernel: decoder_forward.1
= control target key start
LH: loop header
LB: loop body
LE: loop exit
PB: predicated region body
PF: predicated region fallthrough
CT: control target
= control target key end

     0   :  { %s542_s18 = smov 0   ;;  %s544_s19 = smov 0   ;;  %s617_s0 = inlined_call_operand.vmem [shape: f32[2,4,256], index: 0, kind: input, shape index: {}]   ;;  %s618_s1 = inlined_call_operand.vmem [shape: f32[4,1], index: 1, kind: input, shape index: {}]   ;;  %s619_s2 = inlined_call_operand.vmem [shape: f32[4,1], index: 2, kind: input, shape index: {}]   ;;  %s620_s3 = inlined_call_operand.vmem [shape: f32[8,4], index: 3, kind: input, shape index: {}]   ;;  %s621_s4 = inlined_call_operand.vmem [shape: f32[8,1], index: 4, kind: input, shape index: {}]   ;;  %s622_s5 = inlined_call_operand.vmem [shape: f32[2,8,256], index: 5, kind: output, shape index: {}]  }
   0x1   :  { %s546_s20 = smov 0   ;;  %s548_s21 = smov 0  }
   0x2   :  { %s550_s22 = smov 0  }
   0x3 LB: > { %s24_s23 = sadd.s32 1, %s498_s20  ;;  %s27_s24 = sadd.s32 1, %s502_s21  ;;  %s506_s22 = sphi %s550_s22, %s15_s22   ;;  %s502_s21 = sphi %s548_s21, %s626_s21   ;;  %s498_s20 = sphi %s546_s20, %s625_s20   ;;  %s494_s19 = sphi %s544_s19, %s624_s19   ;;  %s490_s18 = sphi %s542_s18, %s623_s18  }
   0x4   : > { %p25_p0 = scmp.ge.s32.totalorder %s24_s23, 2  ;;  %p411_p1 = scmp.ge.s32.totalorder %s506_s22, 1 }
   0x5   : > { %p206_p2 = scmp.lt.s32.totalorder %s506_s22, 5 }
   0x6   : > { %s628_s23 = smov (%p25_p0, %s24_s23), 0  ;;  %s630_s24 = smov (!%p25_p0, %s27_s24), %s502_s21 }
   0x7   : > { %p207_p3 = pnand %p411_p1, %p206_p2  ;;  %p29_p4 = scmp.ge.s32.totalorder %s630_s24, 2 }
   0x8   : > { %p240_p5 = scmp.lt.s32.totalorder (!%p207_p3), %s494_s19, 1  ;;  %p242_p6 = scmp.lt.s32.totalorder (!%p207_p3), %s490_s18, 1 }
   0x9   : > { %s632_s24 = smov (%p29_p4, %s630_s24), 0  ;;  %210 = sbr.rel (%p207_p3) target bundleno = 161 (0xa1), region = 40 }
   0xe   : > { %v258_v0 = vld [vmem:[%s620_s3] sm:$0xff]  ;;  %v508_v2 = vmov 0   ;;  %v509_v5 = vmov 2   ;;  %v510_v6 = vmov 1   ;;  %v511_v7 = vmov 3   ;;  %s634_s19 = smov (!%p240_p5, %s494_s19), 1 }
   0xf   : > { %v256_v1 = vld [vmem:[%s618_s1] sm:$0xf]  ;;  %463 = vset.pattern.permute.xlu1 %v508_v2  ;;  %462 = vset.pattern.permute.xlu0 %v508_v2  ;;  %s636_s18 = smov (!%p242_p6, %s490_s18), 1  ;;  %s412_s8 = sshll.u32 %s634_s19, 1  ;;  %v279_v8 = vlaneseq }
  0x10   : > { %276 = vperm.xlu1 %463, %v258_v0   ;;  %263 = vperm.xlu0 %462, %v256_v1   ;;  %v259_v3 = vld [vmem:[%s621_s4] sm:$0xff]  ;;  %s592_s9 = sadd.s32 %s412_s8, %s636_s18 }
  0x11   : > { %v257_v4 = vld [vmem:[%s619_s2] sm:$0xf]  ;;  %s413_s10 = sshll.u32 %s592_s9, 2  ;;  %v280_v12 = vshrl.u32 %v279_v8, 7  ;;  %s415_s14 = sshll.u32 %s592_s9, 3 }
  0x12   : > { %s247_s13 = scalar_lea.vmem %s617_s0, %s413_s10  ;;  %s255_s17 = scalar_lea.vmem %s622_s5, %s415_s14 }
  0x13   : > { %v260_v11 = vld [vmem:[%s247_s13] sm:$0xf]  ;;  %v281_v17 = vsub.s32 0, %v280_v12  ;;  %v296_v18 = vsub.s32 1, %v280_v12  ;;  %v306_v20 = vsub.s32 2, %v280_v12  ;;  %v316_v27 = vsub.s32 3, %v280_v12 }
  0x14   : > { %286 = vperm.xlu1 %463, %v259_v3   ;;  %269 = vperm.xlu0 %462, %v257_v4  }
  0x18   : > { %465 = vset.pattern.permute.xlu1 %v509_v5  ;;  %464 = vset.pattern.permute.xlu0 %v510_v6 }
  0x19   : > { %301 = vperm.xlu1 %465, %v258_v0   ;;  %291 = vperm.xlu0 %464, %v258_v0  }
  0x1d   : > { %466 = vset.pattern.permute.xlu1 %v511_v7  ;;  %467 = vset.pattern.permute.xlu0 %v511_v7 }
  0x1e   : > { %311 = vperm.xlu1 %466, %v258_v0  }
  0x8b   : > { %v277_v9 = vpop.permute.xlu1 %276  ;;  %v264_v10 = vpop.permute.xlu0 %263 }
  0x8c   : > { %v266_v13 = vmul.f32 %v264_v10, %v260_v11 }
  0x8f   : > { %v270_v14 = vpop.permute.xlu0 %269  ;;  %v287_v15 = vpop.permute.xlu1 %286 }
  0x90   : > { %v272_v16 = vadd.f32 %v270_v14, %v266_v13 }
  0x92   : > { %v273_v19 = vmax.f32 %v272_v16, 0.0 }
  0x94   : > { %v302_v21 = vpop.permute.xlu1 %301  ;;  %v282_v22 = vrot.slane %v273_v19, %v281_v17  ;;  %v297_v23 = vrot.slane %v273_v19, %v296_v18  ;;  %v292_v24 = vpop.permute.xlu0 %291  ;;  %v307_v25 = vrot.slane %v273_v19, %v306_v20  ;;  %v317_v33 = vrot.slane %v273_v19, %v316_v27 }
  0x96   : > { %v283_v26 = vmul.f32 %v282_v22, %v277_v9  ;;  %v298_v29 = vmul.f32 %v297_v23, %v292_v24  ;;  %v308_v31 = vmul.f32 %v307_v25, %v302_v21 }
  0x98   : > { %v289_v28 = vadd.f32 %v287_v15, %v283_v26 }
  0x99   : > { %v312_v30 = vpop.permute.xlu1 %311 }
  0x9a   : > { %v299_v32 = vadd.f32 %v298_v29, %v289_v28  ;;  %v318_v35 = vmul.f32 %v317_v33, %v312_v30 }
  0x9c   : > { %v309_v34 = vadd.f32 %v308_v31, %v299_v32 }
  0x9e   : > { %v319_v36 = vadd.f32 %v318_v35, %v309_v34 }
  0xa0   : > { %320 = vst [vmem:[%s255_s17] sm:$0xff] %v319_v36 }
  0xa1 PF: > { %s15_s22 = sadd.s32 1, %s506_s22   ;;  %s623_s18 = smov %s498_s20 }
  0xa2   : > { %p12_p7 = scmp.ge.s32.totalorder %s15_s22, 6   ;;  %s624_s19 = smov %s502_s21 }
  0xa3   : > { %s625_s20 = smov %s628_s23  ;;  %s626_s21 = smov %s632_s24 }
  0xa4   :  { %14 = sbr.rel (!%p12_p7) target bundleno = 3 (0x3), region = 70 }

</bundles_post_ra>
